<compile_context>
chip_gen: v5e
topology: v5e:2x2
jax: 0.10.0
libtpu: 0.0.40
codegen_flags: <defaults>
</compile_context>

<pallas_src>
import math

import jax
import jax.numpy as jnp
from jax.experimental import pallas as pl
from jax.experimental.pallas import tpu as pltpu


# ----------------------------------------------------------------------------
# Kernel
# ----------------------------------------------------------------------------
def _add_bias_kernel(x_ref, b_ref, o_ref):
    """o = x + bias, bias (1, W) broadcast over the batch (row) axis."""
    o_ref[...] = x_ref[...] + b_ref[...]


# ----------------------------------------------------------------------------
# Tiling helpers
# ----------------------------------------------------------------------------
_TILE_BUDGET_BYTES = 8 * 1024 * 1024   # ~8 MiB activation tile (4-16 MiB sweet spot)
_VMEM_LIMIT_BYTES = 48 * 1024 * 1024   # 4x tile (double-buffered in+out) + bias + headroom


def _repack_factor(B, D):
    """Smallest r with (r*D) % 128 == 0, grown (x2) toward ~1024-lane rows as
    long as the batch itself is at least that large (keeps padding trivial)."""
    r = 128 // math.gcd(D, 128)
    while r * D < 1024 and r * 2 <= B:
        r *= 2
    return r


def _choose_row_tile(n_rows, row_bytes, sublane, tile_budget_bytes):
    """Batch tile: multiple of `sublane`, ~tile_budget_bytes per tile, with at
    least 2 (and an even number of) grid steps when there is enough work."""
    if n_rows <= sublane:
        return n_rows                                      # single tiny block == full dim
    nb = max(1, -(-(n_rows * row_bytes) // tile_budget_bytes))
    nb = max(nb, 2)                                        # >=2 steps: DMA/compute overlap
    if nb % 2:                                             # even grid: clean v7x 2-TC split
        nb += 1
    nb = min(nb, -(-n_rows // sublane))                    # no sub-sublane blocks
    tb = -(-n_rows // nb)                                  # ceil rows per block
    tb = -(-tb // sublane) * sublane                       # round up to sublane multiple
    if tb >= n_rows:
        return n_rows
    return tb


# ----------------------------------------------------------------------------
# pallas_call wrapper
# ----------------------------------------------------------------------------
def _add_bias_2d(x2d, bias_row, *, donate=False):
    """x2d: (B, W), bias_row: (1, W) -> (B, W)."""
    B, W = x2d.shape
    itemsize = jnp.dtype(x2d.dtype).itemsize
    sublane = {1: 32, 2: 16}.get(itemsize, 8)              # dtype-aware sublane packing
    tb = _choose_row_tile(B, W * itemsize, sublane, _TILE_BUDGET_BYTES)

    kwargs = {}
    if donate:
        # Only safe/free when the caller can donate x2d (it is an XLA
        # intermediate); otherwise XLA inserts a defensive copy.
        kwargs["input_output_aliases"] = {0: 0}

    return pl.pallas_call(
        _add_bias_kernel,
        out_shape=jax.ShapeDtypeStruct((B, W), x2d.dtype),
        grid=(pl.cdiv(B, tb),),
        in_specs=[
            pl.BlockSpec((tb, W), lambda i: (i, 0)),        # streamed activation tile
            pl.BlockSpec((1, W), lambda i: (0, 0)),         # resident bias row
        ],
        out_specs=pl.BlockSpec((tb, W), lambda i: (i, 0)),
        compiler_params=pltpu.CompilerParams(
            dimension_semantics=("parallel",),              # v7x: shard batch across 2 TCs
            vmem_limit_bytes=_VMEM_LIMIT_BYTES,
        ),
        **kwargs,
    )(x2d, bias_row)


def add_bias_forward(x, bias, *, donate=False):
    """Matches AddBias.forward: flatten batch dims, add bias, unflatten."""
    bd = x.shape[:-1]
    D = x.shape[-1]

    # PyTorch-style type promotion for the add (e.g. bf16 x + f32 bias -> f32).
    out_dtype = jnp.promote_types(x.dtype, bias.dtype)
    xf = x.reshape((-1, D)).astype(out_dtype)               # flatten_batch
    b = bias.reshape((-1,)).astype(out_dtype)
    B = xf.shape[0]

    if D % 128 != 0:
        # Lane-dense repack: (B, D) -> (B/r, r*D) with r*D a multiple of 128.
        r = _repack_factor(B, D)
        Bp = -(-B // r) * r
        if Bp != B:
            xf = jnp.pad(xf, ((0, Bp - B), (0, 0)))
        x2d = xf.reshape((Bp // r, r * D))
        bias_row = jnp.tile(b, (r,)).reshape((1, r * D))
    else:
        Bp = B
        x2d = xf
        bias_row = b.reshape((1, D))

    y2d = _add_bias_2d(x2d, bias_row, donate=donate)

    y = y2d.reshape((Bp, D))
    if Bp != B:
        y = y[:B]
    return y.reshape(bd + (D,))                              # unflatten_batch


# ----------------------------------------------------------------------------
if __name__ == "__main__":
    key = jax.random.PRNGKey(0)
    kx, kb, kx2, kx3, kb3 = jax.random.split(key, 5)

    D = 16
    # small input with two batch dims (flattened inside forward)
    x = jax.random.normal(kx, (2, 4, D), dtype=jnp.float32)
    bias = jax.random.normal(kb, (D,), dtype=jnp.float32)

    fwd = jax.jit(add_bias_forward)

    y = fwd(x, bias)
    jax.block_until_ready(y)
    assert y.shape == x.shape, y.shape
    assert jnp.all(jnp.isfinite(y))
    assert jnp.allclose(y, x + bias, atol=1e-6)

    # larger batch -> exercises the lane-dense repack (+pad) and multi-step grid
    x_big = jax.random.normal(kx2, (3, 700, D), dtype=jnp.float32)  # B = 2100
    y_big = fwd(x_big, bias)
    jax.block_until_ready(y_big)
    assert y_big.shape == x_big.shape, y_big.shape
    assert jnp.allclose(y_big, x_big + bias, atol=1e-6)

    # D already a multiple of 128 -> no-repack path
    D3 = 256
    x3 = jax.random.normal(kx3, (300, D3), dtype=jnp.float32)
    b3 = jax.random.normal(kb3, (D3,), dtype=jnp.float32)
    y3 = fwd(x3, b3)
    jax.block_until_ready(y3)
    assert y3.shape == x3.shape, y3.shape
    assert jnp.allclose(y3, x3 + b3, atol=1e-6)

    print("KERNEL_OK")
</pallas_src>

<mosaic_0001>
module attributes {stable_mosaic.version = 11 : i64} {
  func.func @_add_bias_kernel(%arg0: i32, %arg1: memref<1x128xf32, #tpu.memory_space<vmem>>, %arg2: memref<1x128xf32, #tpu.memory_space<vmem>>, %arg3: memref<1x128xf32, #tpu.memory_space<vmem>>) attributes {dimension_semantics = [#tpu.dimension_semantics<parallel>], iteration_bounds = array<i64: 1>, scalar_prefetch = 0 : i64, scratch_operands = 0 : i64, tpu.core_type = #tpu.core_type<tc>, window_params = [{transform_indices = @transform_0, window_bounds = array<i64: 1, 128>}, {pipeline_mode = #tpu.pipeline_mode<synchronous>, transform_indices = @transform_1, window_bounds = array<i64: 1, 128>}, {transform_indices = @transform_2, window_bounds = array<i64: 1, 128>}]} {
    %c0 = arith.constant 0 : index
    %c0_0 = arith.constant 0 : index
    %0 = vector.load %arg1[%c0, %c0_0] : memref<1x128xf32, #tpu.memory_space<vmem>>, vector<1x128xf32>
    %c0_1 = arith.constant 0 : index
    %c0_2 = arith.constant 0 : index
    %1 = vector.load %arg2[%c0_1, %c0_2] : memref<1x128xf32, #tpu.memory_space<vmem>>, vector<1x128xf32>
    %2 = arith.addf %0, %1 : vector<1x128xf32>
    %c0_3 = arith.constant 0 : index
    %c0_4 = arith.constant 0 : index
    %3 = vector.load %arg3[%c0_3, %c0_4] : memref<1x128xf32, #tpu.memory_space<vmem>>, vector<1x128xf32>
    tpu.vector_store %arg3[%c0_3, %c0_4], %2 {strides = array<i32>} : memref<1x128xf32, #tpu.memory_space<vmem>>, vector<1x128xf32>,
    return
  }
  func.func @transform_0(%arg0: i32) -> (i32, i32) {
    %c0_i32 = arith.constant 0 : i32
    %c0_i32_0 = arith.constant 0 : i32
    return %arg0, %c0_i32 : i32, i32
  }
  func.func @transform_1(%arg0: i32) -> (i32, i32) {
    %c0_i32 = arith.constant 0 : i32
    %c0_i32_0 = arith.constant 0 : i32
    %c0_i32_1 = arith.constant 0 : i32
    return %c0_i32, %c0_i32_0 : i32, i32
  }
  func.func @transform_2(%arg0: i32) -> (i32, i32) {
    %c0_i32 = arith.constant 0 : i32
    %c0_i32_0 = arith.constant 0 : i32
    return %arg0, %c0_i32 : i32, i32
  }
}

</mosaic_0001>

<bundles_post_ra>
// kernel: tile.9
= control target key start
LH: loop header
LB: loop body
LE: loop exit
PB: predicated region body
PF: predicated region fallthrough
CT: control target
= control target key end

     0   :  { %s67_s10 = smov 112   ;;  %s68_s11 = smov 80   ;;  %vm3_vm0 = vcmask 130048   ;;  %vm9_vm1 = vcmask 1048448   ;;  %vm15_vm2 = vcmask 917248   ;;  %vm21_vm3 = vcmask 786048   ;;  %s111_s0 = inlined_call_operand.vmem [shape: f32[8,16], index: 0, kind: input, shape index: {}]   ;;  %s112_s1 = inlined_call_operand.vmem [shape: f32[1,128], index: 1, kind: output, shape index: {}]  }
   0x1   :  { %v53_v0 = vld [vmem:[%s111_s0 + $0x7] sm:$0x1]   ;;  %v55_v1 = vld [vmem:[%s111_s0 + $0x5] sm:$0x1]   ;;  %v57_v2 = vld [vmem:[%s111_s0 + $0x3] sm:$0x1]  }
   0x2   :  { %7 = vrot.lane.b32.xlu0 %v53_v0, %s67_s10  ;;  %19 = vrot.lane.b32.xlu1 %v55_v1, %s68_s11  ;;  %s69_s14 = smov 48   ;;  %v54_v3 = vld [vmem:[%s111_s0 + $0x6] sm:$0x1]   ;;  %v56_v4 = vld [vmem:[%s111_s0 + $0x4] sm:$0x1]   ;;  %s70_s21 = smov 96  }
   0x3   :  { %31 = vrot.lane.b32.xlu2 %v57_v2, %s69_s14  ;;  %v58_v5 = vld [vmem:[%s111_s0 + $0x2] sm:$0x1]   ;;  %s71_s22 = smov 64   ;;  %s72_s23 = smov 32   ;;  %v59_v6 = vld [vmem:[%s111_s0 + $0x1] sm:$0x1]  }
   0x4   :  { %s73_s26 = smov 16   ;;  %v2_v7 = vld [vmem:[%s111_s0] sm:$0x1]   ;;  %vm27_vm4 = vcmask 654848   ;;  %vm33_vm5 = vcmask 523648   ;;  %vm39_vm6 = vcmask 392448  }
   0x5   :  { %4 = vst.msk [vmem:[#allocation0] sm:$0x1] %vm3_vm0, %v2_v7   ;;  %vm45_vm7 = vcmask 261248  }
   0xa   :  { %13 = vrot.lane.b32.xlu0 %v54_v3, %s70_s21  ;;  %25 = vrot.lane.b32.xlu1 %v56_v4, %s71_s22 }
   0xb   :  { %37 = vrot.lane.b32.xlu2 %v58_v5, %s72_s23 }
  0x12   :  { %43 = vrot.lane.b32.xlu0 %v59_v6, %s73_s26 }
  0x5d   :  { %v32_v8 = vpop.permute.xlu2 %31  }
  0x65   :  { %v38_v9 = vpop.permute.xlu2 %37  }
  0x74   :  { %v8_v10 = vpop.permute.xlu0 %7   ;;  %v20_v11 = vpop.permute.xlu1 %19  }
  0x75   :  { %10 = vst.msk [vmem:[#allocation0] sm:$0x1] %vm9_vm1, %v8_v10  }
  0x7c   :  { %v14_v12 = vpop.permute.xlu0 %13   ;;  %v26_v13 = vpop.permute.xlu1 %25  }
  0x7d   :  { %16 = vst.msk [vmem:[#allocation0] sm:$0x1] %vm15_vm2, %v14_v12  }
  0x7e   :  { %22 = vst.msk [vmem:[#allocation0] sm:$0x1] %vm21_vm3, %v20_v11  }
  0x7f   :  { %28 = vst.msk [vmem:[#allocation0] sm:$0x1] %vm27_vm4, %v26_v13  }
  0x80   :  { %34 = vst.msk [vmem:[#allocation0] sm:$0x1] %vm33_vm5, %v32_v8  }
  0x81   :  { %40 = vst.msk [vmem:[#allocation0] sm:$0x1] %vm39_vm6, %v38_v9  }
  0x84   :  { %v44_v14 = vpop.permute.xlu0 %43  }
  0x85   :  { %46 = vst.msk [vmem:[#allocation0] sm:$0x1] %vm45_vm7, %v44_v14  }
  0x8c   :  { %v49_v15 = vld [vmem:[#allocation0] sm:$0x1] }
  0x8d   :  { %52 = vst [vmem:[%s112_s1] sm:$0x1] %v49_v15 }

// kernel: tile.8
= control target key start
LH: loop header
LB: loop body
LE: loop exit
PB: predicated region body
PF: predicated region fallthrough
CT: control target
= control target key end

     0   :  { %2 = vsyncpa [#allocation1], 0  ;;  %s48_s8 = smov [#allocation0]   ;;  %s65_s0 = inlined_call_operand.hbm [shape: f32[16], index: 0, kind: input, shape index: {}]   ;;  %s66_s1 = inlined_call_operand.vmem [shape: f32[8,16], index: 1, kind: output, shape index: {}]  }
   0x1   :  { %s8_s0 = sshll.u32 %s65_s0, 4  ;;  %s10_s9 = sshll.u32 %s48_s8, 4  ;;  %s9_s0 = int_to_ptr.hbm [resolvable:$true] %s8_s0  ;;  %s11_s9 = int_to_ptr.vmem [resolvable:$true] %s10_s9 }
   0x2   :  { %13 = dma.hbm_to_vmem [thread:$0]  %s9_s0, 16, %s11_s9, [#allocation1]  }
   0x3   :  { %46 = dma.done.wait [#allocation1], 16  }
   0x4   :  { %47 = vsyncadd [#allocation1], 4294967280  ;;  %v18_v0 = vld [vmem:[#allocation0] ss:$0 sm:$0xff] }
   0x5   :  { %19 = vst [vmem:[%s66_s1] sm:$0xff] %v18_v0 }
   0x6   :  { %20 = vsyncpa [#allocation1], 1 }

</bundles_post_ra>
